<compile_context>
chip_gen: v6e
topology: v6e:2x2x1
jax: 0.10.0
libtpu: 0.0.40
codegen_flags: <defaults>
</compile_context>

<pallas_src>
import functools

import jax
import jax.numpy as jnp
import numpy as np
from jax.experimental import pallas as pl
from jax.experimental.pallas import tpu as pltpu

_LANE = 128      # lane width (last dim alignment)
_SUBLANE = 8     # sublane count (second-to-last dim alignment, f32)

# Conservative fused-kernel VMEM budget (v5e scoped default is 16 MiB).
_FUSED_VMEM_BUDGET_BYTES = 12 * 1024 * 1024


def _round_up(x, m):
    return (x + m - 1) // m * m


# ----------------------------- fused MLP kernel -----------------------------

def _fused_mlp_kernel(*refs, num_layers):
    """refs = (x_ref, w0, b0, w1, b1, ..., w_{L-1}, b_{L-1}, out_ref).

    Computes h = x; for each layer: h = h @ w + b (ReLU on all but the last
    layer); writes h to out_ref.  Everything stays in VMEM / vregs.
    """
    x_ref = refs[0]
    out_ref = refs[-1]
    wb = refs[1:-1]

    h = x_ref[...]
    for i in range(num_layers):
        w = wb[2 * i][...]
        b = wb[2 * i + 1][...]                      # (1, Np) -> broadcasts
        # NOTE: at larger widths, cast h/w to bf16 here (keep f32 accumulate)
        # for ~3x MXU throughput; irrelevant at these tiny shapes.
        h = jnp.dot(h, w, preferred_element_type=jnp.float32) + b
        if i < num_layers - 1:                      # last layer: no activation
            h = jnp.maximum(h, 0.0)
    out_ref[...] = h.astype(out_ref.dtype)


# ------------------------- one-time parameter prep --------------------------

def prepare_params(params):
    """Pad weights/biases ONCE (outside the hot path) into a flat tuple.

    Layer i weight is padded to (prev_padded_width, round_up(N_i, 128)) with
    zeros; bias to (1, round_up(N_i, 128)) with zeros in the pad (so padded
    activation columns remain exactly zero through every ReLU).
    """
    layers = list(params["base"]) + list(params["append"]) + [params["last"]]
    in_dim = layers[0][0].shape[0]
    out_dim = layers[-1][0].shape[1]

    prev_pad = _round_up(in_dim, _LANE)
    packed = []
    for (w, b) in layers:
        K, N = w.shape
        Np = _round_up(N, _LANE)
        wp = jnp.zeros((prev_pad, Np), jnp.float32).at[:K, :N].set(w)
        bp = jnp.zeros((1, Np), jnp.float32).at[0, :N].set(b)
        packed.extend([wp, bp])
        prev_pad = Np
    return tuple(packed), in_dim, out_dim


# ------------------------------- Net forward --------------------------------

def make_fused_forward(packed_params, in_dim, out_dim):
    """Build a jitted forward: pad x once -> one fused pallas_call -> slice."""
    out_pad = packed_params[-2].shape[1]
    num_layers = len(packed_params) // 2
    kernel = functools.partial(_fused_mlp_kernel, num_layers=num_layers)

    # VMEM sanity check for the fused kernel (params + widest activation).
    param_bytes = sum(int(np.prod(p.shape)) * p.dtype.itemsize
                      for p in packed_params)
    assert param_bytes < _FUSED_VMEM_BUDGET_BYTES, (
        "fused MLP too large for single-kernel VMEM residency")
    # TODO(synk): fall back to a tiled per-layer kernel (K-innermost f32
    # accumulator, parallel M/N grid) when this assert trips at scale.

    def fwd(x, packed):
        M, K = x.shape
        Mp = _round_up(M, _SUBLANE)
        Kp = _round_up(in_dim, _LANE)
        xp = x if (Mp == M and Kp == K) else jnp.pad(
            x, ((0, Mp - M), (0, Kp - K)))

        n_in = 1 + len(packed)
        vmem = pltpu.MemorySpace.VMEM
        out = pl.pallas_call(
            kernel,
            out_shape=jax.ShapeDtypeStruct((Mp, out_pad), jnp.float32),
            in_specs=[pl.BlockSpec(memory_space=vmem)] * n_in,
            out_specs=pl.BlockSpec(memory_space=vmem),
        )(xp, *packed)
        return out[:M, :out_dim]

    return jax.jit(fwd)


def _reference_forward(x, params):
    out = x
    for w, b in list(params["base"]) + list(params["append"]):
        out = jnp.maximum(
            jnp.dot(out, w, precision=jax.lax.Precision.HIGHEST) + b, 0.0)
    w, b = params["last"]
    return jnp.dot(out, w, precision=jax.lax.Precision.HIGHEST) + b


# ---------------------- parameter init (mimics the spec) --------------------

def _fanin_linear(key, d_in, d_out):
    # torch Linear weight is [out_features, in_features]; _fanin_init uses
    # weight.size(0) (= out_features) as fan_in; bias is filled with 0.1.
    bound = float(np.sqrt(1.0 / d_out))
    w = jax.random.uniform(key, (d_in, d_out), jnp.float32, -bound, bound)
    b = jnp.full((d_out,), 0.1, dtype=jnp.float32)
    return w, b


def _uniform_linear(key, d_in, d_out, param=3e-3):
    kw, kb = jax.random.split(key)
    w = jax.random.uniform(kw, (d_in, d_out), jnp.float32, -param, param)
    b = jax.random.uniform(kb, (d_out,), jnp.float32, -param, param)
    return w, b


if __name__ == "__main__":
    # TODO(synk): `base_type` is an injected constructor in the spec; it is
    # instantiated here as the standard MLPBase (Linear+ReLU stack). A conv
    # base would need a separate convolution kernel.
    batch, input_dim = 8, 16
    base_hidden = (32, 32)
    append_hidden = (32,)
    output_dim = 4

    key = jax.random.PRNGKey(0)
    kx, k0, k1, k2, k3 = jax.random.split(key, 5)

    params = {"base": [], "append": [], "last": None}
    d = input_dim
    for k, h in zip((k0, k1), base_hidden):
        params["base"].append(_fanin_linear(k, d, h))
        d = h
    for k, h in zip((k2,), append_hidden):
        params["append"].append(_fanin_linear(k, d, h))
        d = h
    params["last"] = _uniform_linear(k3, d, output_dim)

    # One-time padding/packing of the parameters (outside the hot path).
    packed, in_dim, out_dim = prepare_params(params)
    forward = make_fused_forward(packed, in_dim, out_dim)

    x = jax.random.normal(kx, (batch, input_dim), dtype=jnp.float32)

    out = forward(x, packed)
    jax.block_until_ready(out)
    assert out.shape == (batch, output_dim)

    # Sanity check against a pure-JAX reference (loose tolerance to allow for
    # MXU accumulation-order / pass differences on f32 matmuls).
    ref = _reference_forward(x, params)
    np.testing.assert_allclose(np.asarray(out), np.asarray(ref),
                               atol=1e-2, rtol=1e-2)

    print("KERNEL_OK")
</pallas_src>

<mosaic_0001>
module attributes {stable_mosaic.version = 11 : i64} {
  func.func @_fused_mlp_kernel(%arg0: memref<8x128xf32, #tpu.memory_space<vmem>>, %arg1: memref<128x128xf32, #tpu.memory_space<vmem>>, %arg2: memref<1x128xf32, #tpu.memory_space<vmem>>, %arg3: memref<128x128xf32, #tpu.memory_space<vmem>>, %arg4: memref<1x128xf32, #tpu.memory_space<vmem>>, %arg5: memref<128x128xf32, #tpu.memory_space<vmem>>, %arg6: memref<1x128xf32, #tpu.memory_space<vmem>>, %arg7: memref<128x128xf32, #tpu.memory_space<vmem>>, %arg8: memref<1x128xf32, #tpu.memory_space<vmem>>, %arg9: memref<8x128xf32, #tpu.memory_space<vmem>>) attributes {dimension_semantics = [], scalar_prefetch = 0 : i64, scratch_operands = 0 : i64, tpu.core_type = #tpu.core_type<tc>} {
    %c0 = arith.constant 0 : index
    %c0_0 = arith.constant 0 : index
    %0 = vector.load %arg0[%c0, %c0_0] : memref<8x128xf32, #tpu.memory_space<vmem>>, vector<8x128xf32>
    %c0_1 = arith.constant 0 : index
    %c0_2 = arith.constant 0 : index
    %1 = vector.load %arg1[%c0_1, %c0_2] : memref<128x128xf32, #tpu.memory_space<vmem>>, vector<128x128xf32>
    %c0_3 = arith.constant 0 : index
    %c0_4 = arith.constant 0 : index
    %2 = vector.load %arg2[%c0_3, %c0_4] : memref<1x128xf32, #tpu.memory_space<vmem>>, vector<1x128xf32>
    %cst = arith.constant dense<0.000000e+00> : vector<8x128xf32>
    %3 = tpu.matmul %0, %1, %cst {dimension_numbers = #tpu.dot_dimension_numbers<[1], [0], [0], [1], [0, 0, 1, 1], [], []>} : vector<8x128xf32>, vector<128x128xf32>, vector<8x128xf32> -> vector<8x128xf32>
    %4 = vector.broadcast %2 : vector<1x128xf32> to vector<8x128xf32>
    %5 = arith.addf %3, %4 : vector<8x128xf32>
    %cst_5 = arith.constant 0.000000e+00 : f32
    %6 = vector.broadcast %cst_5 : f32 to vector<8x128xf32>
    %7 = arith.maximumf %5, %6 : vector<8x128xf32>
    %c0_6 = arith.constant 0 : index
    %c0_7 = arith.constant 0 : index
    %8 = vector.load %arg3[%c0_6, %c0_7] : memref<128x128xf32, #tpu.memory_space<vmem>>, vector<128x128xf32>
    %c0_8 = arith.constant 0 : index
    %c0_9 = arith.constant 0 : index
    %9 = vector.load %arg4[%c0_8, %c0_9] : memref<1x128xf32, #tpu.memory_space<vmem>>, vector<1x128xf32>
    %cst_10 = arith.constant dense<0.000000e+00> : vector<8x128xf32>
    %10 = tpu.matmul %7, %8, %cst_10 {dimension_numbers = #tpu.dot_dimension_numbers<[1], [0], [0], [1], [0, 0, 1, 1], [], []>} : vector<8x128xf32>, vector<128x128xf32>, vector<8x128xf32> -> vector<8x128xf32>
    %11 = vector.broadcast %9 : vector<1x128xf32> to vector<8x128xf32>
    %12 = arith.addf %10, %11 : vector<8x128xf32>
    %cst_11 = arith.constant 0.000000e+00 : f32
    %13 = vector.broadcast %cst_11 : f32 to vector<8x128xf32>
    %14 = arith.maximumf %12, %13 : vector<8x128xf32>
    %c0_12 = arith.constant 0 : index
    %c0_13 = arith.constant 0 : index
    %15 = vector.load %arg5[%c0_12, %c0_13] : memref<128x128xf32, #tpu.memory_space<vmem>>, vector<128x128xf32>
    %c0_14 = arith.constant 0 : index
    %c0_15 = arith.constant 0 : index
    %16 = vector.load %arg6[%c0_14, %c0_15] : memref<1x128xf32, #tpu.memory_space<vmem>>, vector<1x128xf32>
    %cst_16 = arith.constant dense<0.000000e+00> : vector<8x128xf32>
    %17 = tpu.matmul %14, %15, %cst_16 {dimension_numbers = #tpu.dot_dimension_numbers<[1], [0], [0], [1], [0, 0, 1, 1], [], []>} : vector<8x128xf32>, vector<128x128xf32>, vector<8x128xf32> -> vector<8x128xf32>
    %18 = vector.broadcast %16 : vector<1x128xf32> to vector<8x128xf32>
    %19 = arith.addf %17, %18 : vector<8x128xf32>
    %cst_17 = arith.constant 0.000000e+00 : f32
    %20 = vector.broadcast %cst_17 : f32 to vector<8x128xf32>
    %21 = arith.maximumf %19, %20 : vector<8x128xf32>
    %c0_18 = arith.constant 0 : index
    %c0_19 = arith.constant 0 : index
    %22 = vector.load %arg7[%c0_18, %c0_19] : memref<128x128xf32, #tpu.memory_space<vmem>>, vector<128x128xf32>
    %c0_20 = arith.constant 0 : index
    %c0_21 = arith.constant 0 : index
    %23 = vector.load %arg8[%c0_20, %c0_21] : memref<1x128xf32, #tpu.memory_space<vmem>>, vector<1x128xf32>
    %cst_22 = arith.constant dense<0.000000e+00> : vector<8x128xf32>
    %24 = tpu.matmul %21, %22, %cst_22 {dimension_numbers = #tpu.dot_dimension_numbers<[1], [0], [0], [1], [0, 0, 1, 1], [], []>} : vector<8x128xf32>, vector<128x128xf32>, vector<8x128xf32> -> vector<8x128xf32>
    %25 = vector.broadcast %23 : vector<1x128xf32> to vector<8x128xf32>
    %26 = arith.addf %24, %25 : vector<8x128xf32>
    %c0_23 = arith.constant 0 : index
    %c0_24 = arith.constant 0 : index
    %27 = vector.load %arg9[%c0_23, %c0_24] : memref<8x128xf32, #tpu.memory_space<vmem>>, vector<8x128xf32>
    tpu.vector_store %arg9[%c0_23, %c0_24], %26 {strides = array<i32>} : memref<8x128xf32, #tpu.memory_space<vmem>>, vector<8x128xf32>,
    return
  }
}

</mosaic_0001>

<bundles_post_ra>
// kernel: fwd.1
= control target key start
LH: loop header
LB: loop body
LE: loop exit
PB: predicated region body
PF: predicated region fallthrough
CT: control target
= control target key end

     0   :  { %14 = vsyncpa [#allocation3], 0  ;;  %s949_s0 = inlined_call_operand.vmem [shape: f32[8,128], index: 0, kind: input, shape index: {}]   ;;  %s950_s1 = inlined_call_operand.hbm [shape: f32[128,128], index: 1, kind: input, shape index: {}]   ;;  %s951_s2 = inlined_call_operand.vmem [shape: f32[1,128], index: 2, kind: input, shape index: {}]   ;;  %s952_s3 = inlined_call_operand.hbm [shape: f32[128,128], index: 3, kind: input, shape index: {}]   ;;  %s953_s4 = inlined_call_operand.vmem [shape: f32[1,128], index: 4, kind: input, shape index: {}]   ;;  %s954_s5 = inlined_call_operand.hbm [shape: f32[128,128], index: 5, kind: input, shape index: {}]   ;;  %s955_s6 = inlined_call_operand.vmem [shape: f32[1,128], index: 6, kind: input, shape index: {}]   ;;  %s956_s7 = inlined_call_operand.hbm [shape: f32[128,128], index: 7, kind: input, shape index: {}]   ;;  %s957_s8 = inlined_call_operand.vmem [shape: f32[1,128], index: 8, kind: input, shape index: {}]   ;;  %s958_s9 = inlined_call_operand.vmem [shape: f32[8,128], index: 9, kind: output, shape index: {}]  }
   0x1   :  { %15 = vsyncpa [#allocation5], 0 }
   0x2   :  { %16 = vsyncpa [#allocation8], 0  ;;  %s777_s30 = smov [#allocation4]   ;;  %s778_s11 = smov [#allocation2]  }
   0x3   :  { %s38_s10 = sshll.u32 %s777_s30, 4  ;;  %s24_s12 = sshll.u32 %s778_s11, 4  ;;  %s39_s10 = int_to_ptr.vmem [resolvable:$true] %s38_s10  ;;  %s25_s12 = int_to_ptr.vmem [resolvable:$true] %s24_s12 }
   0x4   :  { %s699_s13 = scalar_lea.vmem %s39_s10, 2048  ;;  %p704_p1 = scmp.lt.s32.totalorder %s39_s10, %s39_s10 }
   0x5   :  { %p700_p0 = scmp.ne.s32.totalorder %s39_s10, %s699_s13  ;;  %p705_p2 = scmp.lt.s32.totalorder %s699_s13, %s699_s13 }
   0x7   :  { %p706_p3 = por %p705_p2, %p704_p1 }
   0x9   :  { %p707_p4 = pnand %p706_p3, %p700_p0 }
   0xb   :  { %710 = shalt.err (!%p707_p4)
}
   0xc   :  { %s779_s14 = smov 128   ;;  %s780_s15 = smov 8  }
   0xd   :  { %44 = dma.hbm_to_vmem [thread:$0]  %s952_s3, 2048, %s39_s10, [#allocation5], %s779_s14, %s779_s14, %s780_s15  }
   0xe   :  { %s719_s18 = scalar_lea.vmem %s25_s12, 2048  ;;  %p724_p6 = scmp.lt.s32.totalorder %s25_s12, %s25_s12 }
   0xf   :  { %p720_p5 = scmp.ne.s32.totalorder %s25_s12, %s719_s18  ;;  %p725_p7 = scmp.lt.s32.totalorder %s719_s18, %s719_s18 }
  0x11   :  { %p726_p8 = por %p725_p7, %p724_p6 }
  0x13   :  { %p727_p9 = pnand %p726_p8, %p720_p5 }
  0x15   :  { %730 = shalt.err (!%p727_p9)
}
  0x16   :  { %30 = dma.hbm_to_vmem [thread:$0]  %s950_s1, 2048, %s25_s12, [#allocation3], %s779_s14, %s779_s14, %s780_s15  }
  0x17   :  { %s781_s21 = smov [#allocation6]   ;;  %s782_s23 = smov [#allocation7]  }
  0x18   :  { %s52_s22 = sshll.u32 %s781_s21, 4  ;;  %s66_s24 = sshll.u32 %s782_s23, 4  ;;  %s53_s22 = int_to_ptr.vmem [resolvable:$true] %s52_s22  ;;  %s67_s24 = int_to_ptr.vmem [resolvable:$true] %s66_s24 }
  0x19   :  { %s739_s3 = scalar_lea.vmem %s53_s22, 2048  ;;  %p744_p11 = scmp.lt.s32.totalorder %s53_s22, %s53_s22 }
  0x1a   :  { %p740_p10 = scmp.ne.s32.totalorder %s53_s22, %s739_s3  ;;  %p745_p12 = scmp.lt.s32.totalorder %s739_s3, %s739_s3 }
  0x1c   :  { %p746_p13 = por %p745_p12, %p744_p11 }
  0x1e   :  { %p747_p0 = pnand %p746_p13, %p740_p10 }
  0x20   :  { %750 = shalt.err (!%p747_p0)
}
  0x21   :  { %58 = dma.hbm_to_vmem [thread:$0]  %s954_s5, 2048, %s53_s22, [#allocation5], %s779_s14, %s779_s14, %s780_s15  }
  0x22   :  { %s759_s1 = scalar_lea.vmem %s67_s24, 2048  ;;  %p764_p2 = scmp.lt.s32.totalorder %s67_s24, %s67_s24 }
  0x23   :  { %p760_p1 = scmp.ne.s32.totalorder %s67_s24, %s759_s1  ;;  %p765_p3 = scmp.lt.s32.totalorder %s759_s1, %s759_s1 }
  0x25   :  { %p766_p4 = por %p765_p3, %p764_p2 }
  0x27   :  { %p767_p5 = pnand %p766_p4, %p760_p1 }
  0x29   :  { %770 = shalt.err (!%p767_p5)
}
  0x2a   :  { %72 = dma.hbm_to_vmem [thread:$0]  %s956_s7, 2048, %s67_s24, [#allocation8], %s779_s14, %s779_s14, %s780_s15  }
  0x2b   :  { %771 = dma.done.wait [#allocation3], 2048  }
  0x2c   :  { %772 = vsyncadd [#allocation3], 4294965248 }
  0x2d   :  { %773 = dma.done.wait [#allocation5], 4096  }
  0x2e   :  { %774 = vsyncadd [#allocation5], 4294963200 }
  0x2f   :  { %775 = dma.done.wait [#allocation8], 2048  }
  0x30   :  { %776 = vsyncadd [#allocation8], 4294965248  ;;  %v783_v0 = vmov 0.0   ;;  %vm784_vm0 = vmmov 0   ;;  %v103_v1 = vld [vmem:[#allocation2 + $0x78] sm:$0xff]  ;;  %v102_v2 = vld [vmem:[#allocation2 + $0x70] sm:$0xff] }
  0x31   :  { %543 = vmatprep.subr.mxu0 %v783_v0  ;;  %575 = vmatprep.mubr.msk.f32.mxu0 %vm784_vm0, %v783_v0  ;;  %v101_v3 = vld [vmem:[#allocation2 + $0x68] sm:$0xff]  ;;  %v100_v4 = vld [vmem:[#allocation2 + $0x60] sm:$0xff]  ;;  %v197_v5 = vld [vmem:[#allocation4 + $0x78] sm:$0xff] }
  0x32   :  { %578 = vmatprep.subr.mxu1 %v783_v0  ;;  %610 = vmatprep.mubr.msk.f32.mxu1 %vm784_vm0, %v783_v0  ;;  %v99_v6 = vld [vmem:[#allocation2 + $0x58] sm:$0xff]  ;;  %v196_v7 = vld [vmem:[#allocation4 + $0x70] sm:$0xff]  ;;  %v195_v8 = vld [vmem:[#allocation4 + $0x68] sm:$0xff] }
  0x33   :  { %544 = vmatpush3.msra.mxu0 %v103_v1  ;;  %579 = vmatpush3.msra.mxu1 %v197_v5  ;;  %v98_v9 = vld [vmem:[#allocation2 + $0x50] sm:$0xff]  ;;  %v194_v10 = vld [vmem:[#allocation4 + $0x60] sm:$0xff]  ;;  %v97_v11 = vld [vmem:[#allocation2 + $0x48] sm:$0xff] }
  0x34   :  { %545 = vmatprep.subr.mxu0 %v783_v0  ;;  %580 = vmatprep.subr.mxu1 %v783_v0  ;;  %v193_v12 = vld [vmem:[#allocation4 + $0x58] sm:$0xff]  ;;  %v96_v13 = vld [vmem:[#allocation2 + $0x40] sm:$0xff]  ;;  %v192_v14 = vld [vmem:[#allocation4 + $0x50] sm:$0xff] }
  0x35   :  { %546 = vmatpush3.msra.mxu0 %v102_v2  ;;  %581 = vmatpush3.msra.mxu1 %v196_v7  ;;  %v95_v15 = vld [vmem:[#allocation2 + $0x38] sm:$0xff]  ;;  %v191_v16 = vld [vmem:[#allocation4 + $0x48] sm:$0xff]  ;;  %v94_v17 = vld [vmem:[#allocation2 + $0x30] sm:$0xff] }
  0x36   :  { %547 = vmatprep.subr.mxu0 %v783_v0  ;;  %582 = vmatprep.subr.mxu1 %v783_v0  ;;  %v190_v18 = vld [vmem:[#allocation4 + $0x40] sm:$0xff]  ;;  %v93_v19 = vld [vmem:[#allocation2 + $0x28] sm:$0xff]  ;;  %v189_v20 = vld [vmem:[#allocation4 + $0x38] sm:$0xff] }
  0x37   :  { %548 = vmatpush3.msra.mxu0 %v101_v3  ;;  %583 = vmatpush3.msra.mxu1 %v195_v8  ;;  %v92_v21 = vld [vmem:[#allocation2 + $0x20] sm:$0xff]  ;;  %v188_v22 = vld [vmem:[#allocation4 + $0x30] sm:$0xff]  ;;  %v91_v23 = vld [vmem:[#allocation2 + $0x18] sm:$0xff] }
  0x38   :  { %549 = vmatprep.subr.mxu0 %v783_v0  ;;  %584 = vmatprep.subr.mxu1 %v783_v0  ;;  %v187_v24 = vld [vmem:[#allocation4 + $0x28] sm:$0xff]  ;;  %v90_v25 = vld [vmem:[#allocation2 + $0x10] sm:$0xff]  ;;  %v186_v26 = vld [vmem:[#allocation4 + $0x20] sm:$0xff] }
  0x39   :  { %550 = vmatpush3.msra.mxu0 %v100_v4  ;;  %585 = vmatpush3.msra.mxu1 %v194_v10  ;;  %v89_v27 = vld [vmem:[#allocation2 + $0x8] sm:$0xff]  ;;  %v185_v28 = vld [vmem:[#allocation4 + $0x18] sm:$0xff]  ;;  %v88_v29 = vld [vmem:[#allocation2] sm:$0xff] }
  0x3a   :  { %551 = vmatprep.subr.mxu0 %v783_v0  ;;  %586 = vmatprep.subr.mxu1 %v783_v0  ;;  %v87_v30 = vld [vmem:[%s949_s0] sm:$0xff]  ;;  %v184_v31 = vld [vmem:[#allocation4 + $0x10] sm:$0xff]  ;;  %v183_v32 = vld [vmem:[#allocation4 + $0x8] sm:$0xff] }
  0x3b   :  { %552 = vmatpush3.msra.mxu0 %v99_v6  ;;  %587 = vmatpush3.msra.mxu1 %v193_v12  ;;  %v182_v33 = vld [vmem:[#allocation4] sm:$0xff]  ;;  %v291_v34 = vld [vmem:[#allocation6 + $0x78] sm:$0xff]  ;;  %v290_v35 = vld [vmem:[#allocation6 + $0x70] sm:$0xff] }
  0x3c   :  { %553 = vmatprep.subr.mxu0 %v783_v0  ;;  %588 = vmatprep.subr.mxu1 %v783_v0  ;;  %v289_v36 = vld [vmem:[#allocation6 + $0x68] sm:$0xff]  ;;  %v288_v37 = vld [vmem:[#allocation6 + $0x60] sm:$0xff]  ;;  %v287_v38 = vld [vmem:[#allocation6 + $0x58] sm:$0xff] }
  0x3d   :  { %554 = vmatpush3.msra.mxu0 %v98_v9  ;;  %589 = vmatpush3.msra.mxu1 %v192_v14  ;;  %v286_v39 = vld [vmem:[#allocation6 + $0x50] sm:$0xff]  ;;  %v285_v40 = vld [vmem:[#allocation6 + $0x48] sm:$0xff]  ;;  %v284_v41 = vld [vmem:[#allocation6 + $0x40] sm:$0xff] }
  0x3e   :  { %555 = vmatprep.subr.mxu0 %v783_v0  ;;  %590 = vmatprep.subr.mxu1 %v783_v0  ;;  %v283_v42 = vld [vmem:[#allocation6 + $0x38] sm:$0xff]  ;;  %v282_v43 = vld [vmem:[#allocation6 + $0x30] sm:$0xff]  ;;  %v281_v44 = vld [vmem:[#allocation6 + $0x28] sm:$0xff] }
  0x3f   :  { %556 = vmatpush3.msra.mxu0 %v97_v11  ;;  %591 = vmatpush3.msra.mxu1 %v191_v16  ;;  %v280_v45 = vld [vmem:[#allocation6 + $0x20] sm:$0xff]  ;;  %v279_v46 = vld [vmem:[#allocation6 + $0x18] sm:$0xff]  ;;  %v278_v52 = vld [vmem:[#allocation6 + $0x10] sm:$0xff] }
  0x40   :  { %557 = vmatprep.subr.mxu0 %v783_v0  ;;  %592 = vmatprep.subr.mxu1 %v783_v0  ;;  %v471_v47 = vld [vmem:[%s951_s2] ss:$0 sm:$0xff]  ;;  %v277_v53 = vld [vmem:[#allocation6 + $0x8] sm:$0xff]  ;;  %v385_v55 = vld [vmem:[#allocation7 + $0x78] sm:$0xff] }
  0x41   :  { %558 = vmatpush3.msra.mxu0 %v96_v13  ;;  %593 = vmatpush3.msra.mxu1 %v190_v18  ;;  %v276_v54 = vld [vmem:[#allocation6] sm:$0xff]  ;;  %v384_v56 = vld [vmem:[#allocation7 + $0x70] sm:$0xff]  ;;  %v383_v57 = vld [vmem:[#allocation7 + $0x68] sm:$0xff] }
  0x42   :  { %559 = vmatprep.subr.mxu0 %v783_v0  ;;  %594 = vmatprep.subr.mxu1 %v783_v0  ;;  %v382_v58 = vld [vmem:[#allocation7 + $0x60] sm:$0xff]  ;;  %v381_v59 = vld [vmem:[#allocation7 + $0x58] sm:$0xff]  ;;  %v380_v60 = vld [vmem:[#allocation7 + $0x50] sm:$0xff] }
  0x43   :  { %560 = vmatpush3.msra.mxu0 %v95_v15  ;;  %595 = vmatpush3.msra.mxu1 %v189_v20  ;;  %v379_v61 = vld [vmem:[#allocation7 + $0x48] sm:$0xff]  ;;  %v378_v62 = vld [vmem:[#allocation7 + $0x40] sm:$0xff]  ;;  %v377_v63 = vld [vmem:[#allocation7 + $0x38] sm:$0xff] }
  0x44   :  { %561 = vmatprep.subr.mxu0 %v783_v0  ;;  %596 = vmatprep.subr.mxu1 %v783_v0  ;;  %v376_v1 = vld [vmem:[#allocation7 + $0x30] sm:$0xff]  ;;  %v375_v2 = vld [vmem:[#allocation7 + $0x28] sm:$0xff]  ;;  %v374_v3 = vld [vmem:[#allocation7 + $0x20] sm:$0xff] }
  0x45   :  { %562 = vmatpush3.msra.mxu0 %v94_v17  ;;  %597 = vmatpush3.msra.mxu1 %v188_v22  ;;  %v373_v4 = vld [vmem:[#allocation7 + $0x18] sm:$0xff]  ;;  %v472_v5 = vld [vmem:[%s953_s4] ss:$0 sm:$0xff]  ;;  %v372_v10 = vld [vmem:[#allocation7 + $0x10] sm:$0xff] }
  0x46   :  { %563 = vmatprep.subr.mxu0 %v783_v0  ;;  %598 = vmatprep.subr.mxu1 %v783_v0  ;;  %v371_v11 = vld [vmem:[#allocation7 + $0x8] sm:$0xff]  ;;  %v370_v12 = vld [vmem:[#allocation7] sm:$0xff] }
  0x47   :  { %564 = vmatpush3.msra.mxu0 %v93_v19  ;;  %599 = vmatpush3.msra.mxu1 %v187_v24  ;;  %v473_v13 = vld [vmem:[%s955_s6] ss:$0 sm:$0xff] }
  0x48   :  { %565 = vmatprep.subr.mxu0 %v783_v0  ;;  %600 = vmatprep.subr.mxu1 %v783_v0  ;;  %v474_v18 = vld [vmem:[%s957_s8] ss:$0 sm:$0xff] }
  0x49   :  { %566 = vmatpush3.msra.mxu0 %v92_v21  ;;  %601 = vmatpush3.msra.mxu1 %v186_v26 }
  0x4a   :  { %567 = vmatprep.subr.mxu0 %v783_v0  ;;  %602 = vmatprep.subr.mxu1 %v783_v0 }
  0x4b   :  { %568 = vmatpush3.msra.mxu0 %v91_v23  ;;  %603 = vmatpush3.msra.mxu1 %v185_v28 }
  0x4c   :  { %569 = vmatprep.subr.mxu0 %v783_v0  ;;  %604 = vmatprep.subr.mxu1 %v783_v0 }
  0x4d   :  { %570 = vmatpush3.msra.mxu0 %v90_v25  ;;  %605 = vmatpush3.msra.mxu1 %v184_v31 }
  0x4e   :  { %571 = vmatprep.subr.mxu0 %v783_v0  ;;  %606 = vmatprep.subr.mxu1 %v783_v0 }
  0x4f   :  { %572 = vmatpush3.msra.mxu0 %v89_v27  ;;  %607 = vmatpush3.msra.mxu1 %v183_v32 }
  0x50   :  { %573 = vmatprep.subr.mxu0 %v783_v0  ;;  %608 = vmatprep.subr.mxu1 %v783_v0 }
  0x51   :  { %574 = vmatpush3.msra.mxu0 %v88_v29  ;;  %609 = vmatpush3.msra.mxu1 %v182_v33 }
  0x52   :  { %576 = vmatmul.mubr.f32.vlgmr.msra.gmra.mxu0 %v87_v30  ;;  %613 = vmatprep.subr.mxu0 %v783_v0 }
  0x53   :  { %645 = vmatprep.mubr.msk.f32.mxu0 %vm784_vm0, %v783_v0  ;;  %648 = vmatprep.subr.mxu1 %v783_v0 }
  0x54   :  { %614 = vmatpush3.msra.mxu0 %v291_v34 }
  0x55   :  { %615 = vmatprep.subr.mxu0 %v783_v0 }
  0x56   :  { %616 = vmatpush3.msra.mxu0 %v290_v35 }
  0x57   :  { %617 = vmatprep.subr.mxu0 %v783_v0 }
  0x58   :  { %618 = vmatpush3.msra.mxu0 %v289_v36 }
  0x59   :  { %619 = vmatprep.subr.mxu0 %v783_v0 }
  0x5a   :  { %620 = vmatpush3.msra.mxu0 %v288_v37 }
  0x5b   :  { %621 = vmatprep.subr.mxu0 %v783_v0 }
  0x5c   :  { %622 = vmatpush3.msra.mxu0 %v287_v38 }
  0x5d   :  { %623 = vmatprep.subr.mxu0 %v783_v0 }
  0x5e   :  { %624 = vmatpush3.msra.mxu0 %v286_v39 }
  0x5f   :  { %625 = vmatprep.subr.mxu0 %v783_v0 }
  0x60   :  { %626 = vmatpush3.msra.mxu0 %v285_v40 }
  0x61   :  { %627 = vmatprep.subr.mxu0 %v783_v0 }
  0x62   :  { %628 = vmatpush3.msra.mxu0 %v284_v41 }
  0x63   :  { %629 = vmatprep.subr.mxu0 %v783_v0 }
  0x64   :  { %630 = vmatpush3.msra.mxu0 %v283_v42 }
  0x65   :  { %631 = vmatprep.subr.mxu0 %v783_v0 }
  0x66   :  { %632 = vmatpush3.msra.mxu0 %v282_v43 }
  0x67   :  { %633 = vmatprep.subr.mxu0 %v783_v0 }
  0x68   :  { %634 = vmatpush3.msra.mxu0 %v281_v44 }
  0x69   :  { %635 = vmatprep.subr.mxu0 %v783_v0 }
  0x6a   :  { %636 = vmatpush3.msra.mxu0 %v280_v45 }
  0x6b   :  { %637 = vmatprep.subr.mxu0 %v783_v0 }
  0x6c   :  { %638 = vmatpush3.msra.mxu0 %v279_v46 }
  0x6d   :  { %639 = vmatprep.subr.mxu0 %v783_v0 }
  0x6e   :  { %640 = vmatpush3.msra.mxu0 %v278_v52 }
  0x6f   :  { %641 = vmatprep.subr.mxu0 %v783_v0 }
  0x70   :  { %642 = vmatpush3.msra.mxu0 %v277_v53 }
  0x71   :  { %643 = vmatprep.subr.mxu0 %v783_v0 }
  0x72   :  { %644 = vmatpush3.msra.mxu0 %v276_v54 }
 0x112   :  { %v177_v48 = vpop.f32.mrf.mxu0 }
 0x113   :  { %v178_v49 = vadd.f32 %v471_v47, %v177_v48 }
 0x114   :  { %v577_v50 = vpop.f32.mrf.mxu0 }
 0x115   :  { %v181_v51 = vmax.f32 %v178_v49, 0.0 }
 0x117   :  { %611 = vmatmul.mubr.f32.vlgmr.msra.gmra.mxu1 %v181_v51 }
 0x118   :  { %680 = vmatprep.mubr.msk.f32.mxu1 %vm784_vm0, %v783_v0  ;;  %649 = vmatpush3.msra.mxu1 %v385_v55 }
 0x119   :  { %650 = vmatprep.subr.mxu1 %v783_v0 }
 0x11a   :  { %651 = vmatpush3.msra.mxu1 %v384_v56 }
 0x11b   :  { %652 = vmatprep.subr.mxu1 %v783_v0 }
 0x11c   :  { %653 = vmatpush3.msra.mxu1 %v383_v57 }
 0x11d   :  { %654 = vmatprep.subr.mxu1 %v783_v0 }
 0x11e   :  { %655 = vmatpush3.msra.mxu1 %v382_v58 }
 0x11f   :  { %656 = vmatprep.subr.mxu1 %v783_v0 }
 0x120   :  { %657 = vmatpush3.msra.mxu1 %v381_v59 }
 0x121   :  { %658 = vmatprep.subr.mxu1 %v783_v0 }
 0x122   :  { %659 = vmatpush3.msra.mxu1 %v380_v60 }
 0x123   :  { %660 = vmatprep.subr.mxu1 %v783_v0 }
 0x124   :  { %661 = vmatpush3.msra.mxu1 %v379_v61 }
 0x125   :  { %662 = vmatprep.subr.mxu1 %v783_v0 }
 0x126   :  { %663 = vmatpush3.msra.mxu1 %v378_v62 }
 0x127   :  { %664 = vmatprep.subr.mxu1 %v783_v0 }
 0x128   :  { %665 = vmatpush3.msra.mxu1 %v377_v63 }
 0x129   :  { %666 = vmatprep.subr.mxu1 %v783_v0 }
 0x12a   :  { %667 = vmatpush3.msra.mxu1 %v376_v1 }
 0x12b   :  { %668 = vmatprep.subr.mxu1 %v783_v0 }
 0x12c   :  { %669 = vmatpush3.msra.mxu1 %v375_v2 }
 0x12d   :  { %670 = vmatprep.subr.mxu1 %v783_v0 }
 0x12e   :  { %671 = vmatpush3.msra.mxu1 %v374_v3 }
 0x12f   :  { %672 = vmatprep.subr.mxu1 %v783_v0 }
 0x130   :  { %673 = vmatpush3.msra.mxu1 %v373_v4 }
 0x131   :  { %674 = vmatprep.subr.mxu1 %v783_v0 }
 0x132   :  { %675 = vmatpush3.msra.mxu1 %v372_v10 }
 0x133   :  { %676 = vmatprep.subr.mxu1 %v783_v0 }
 0x134   :  { %677 = vmatpush3.msra.mxu1 %v371_v11 }
 0x135   :  { %678 = vmatprep.subr.mxu1 %v783_v0 }
 0x136   :  { %679 = vmatpush3.msra.mxu1 %v370_v12 }
 0x1d7   :  { %v271_v6 = vpop.f32.mrf.mxu1 }
 0x1d8   :  { %v272_v7 = vadd.f32 %v472_v5, %v271_v6 }
 0x1d9   :  { %v612_v8 = vpop.f32.mrf.mxu1 }
 0x1da   :  { %v275_v9 = vmax.f32 %v272_v7, 0.0 }
 0x1dc   :  { %646 = vmatmul.mubr.f32.vlgmr.msra.gmra.mxu0 %v275_v9 }
 0x29c   :  { %v365_v14 = vpop.f32.mrf.mxu0 }
 0x29d   :  { %v366_v15 = vadd.f32 %v473_v13, %v365_v14 }
 0x29e   :  { %v647_v16 = vpop.f32.mrf.mxu0 }
 0x29f   :  { %v369_v17 = vmax.f32 %v366_v15, 0.0 }
 0x2a1   :  { %681 = vmatmul.mubr.f32.vlgmr.msra.gmra.mxu1 %v369_v17 }
 0x361   :  { %v459_v19 = vpop.f32.mrf.mxu1 }
 0x362   :  { %v460_v20 = vadd.f32 %v474_v18, %v459_v19 }
 0x363   :  { %v682_v21 = vpop.f32.mrf.mxu1 }
 0x364   :  { %463 = vst [vmem:[%s958_s9] sm:$0xff] %v460_v20 }
 0x365   :  { %468 = vsyncpa [#allocation3], 1 }
 0x366   :  { %469 = vsyncpa [#allocation5], 1 }
 0x367   :  { %470 = vsyncpa [#allocation8], 1 }

</bundles_post_ra>
